<compile_context>
chip_gen: v6e
topology: v6e:2x2x1
jax: 0.10.0
libtpu: 0.0.40
codegen_flags: <defaults>
</compile_context>

<pallas_src>
import functools

import jax
import jax.numpy as jnp
from jax.experimental import pallas as pl
from jax.experimental.pallas import tpu as pltpu


def _round_up(n, m):
    return ((n + m - 1) // m) * m


def _pad2d(a, rows, cols):
    pr, pc = rows - a.shape[0], cols - a.shape[1]
    if pr == 0 and pc == 0:
        return a
    return jnp.pad(a, ((0, pr), (0, pc)))


def actor_kernel(act_limit, has_goal, *refs):
    """Fused actor MLP: (obs[,goal]) -> Linear/ReLU x2 -> Linear -> tanh -> *act_limit.

    Matmuls run on the MXU in the input dtype (fp32 or bf16) with fp32 accumulation;
    the bias/ReLU/tanh epilogue stays in fp32.
    """
    if has_goal:
        (obs_ref, goal_ref, w1o_ref, w1g_ref, b1_ref,
         w2_ref, b2_ref, w3_ref, b3_ref, o_ref) = refs
    else:
        (obs_ref, w1o_ref, b1_ref,
         w2_ref, b2_ref, w3_ref, b3_ref, o_ref) = refs

    # layer 1 (concat fused as a split matmul over the obs / goal halves of W1)
    acc = jnp.dot(obs_ref[...], w1o_ref[...], preferred_element_type=jnp.float32)
    if has_goal:
        acc = acc + jnp.dot(goal_ref[...], w1g_ref[...],
                            preferred_element_type=jnp.float32)
    h = jnp.maximum(acc + b1_ref[...], 0.0)

    # layer 2: Linear + ReLU
    h = jnp.dot(h.astype(w2_ref.dtype), w2_ref[...],
                preferred_element_type=jnp.float32) + b2_ref[...]
    h = jnp.maximum(h, 0.0)

    # output head: Linear + Tanh, scaled by act_limit
    h = jnp.dot(h.astype(w3_ref.dtype), w3_ref[...],
                preferred_element_type=jnp.float32) + b3_ref[...]
    o_ref[...] = (act_limit * jnp.tanh(h)).astype(o_ref.dtype)


def mlp_general_actor_forward(obs, goal, params, act_limit, *,
                              compute_dtype=jnp.bfloat16, block_batch=512):
    """Pallas-backed forward pass equivalent to MLP_GeneralActor.forward.

    Weights are stored as (in_features, out_features); biases as (out_features,)
    or (1, out_features).
    """
    (w1, b1), (w2, b2), (w3, b3) = params
    batch, obs_dim = obs.shape
    goal_dim = 0 if goal is None else goal.shape[-1]
    has_goal = goal_dim > 0
    h1, h2, act_dim = w1.shape[1], w2.shape[1], w3.shape[1]

    # --- pad to hardware tiles: 128-lane feature dims, 8-sublane batch tiles ---
    od_p = _round_up(obs_dim, 128)
    gd_p = _round_up(goal_dim, 128) if has_goal else 0
    h1_p = _round_up(h1, 128)
    h2_p = _round_up(h2, 128)
    ad_p = _round_up(act_dim, 128)
    tb = min(block_batch, _round_up(batch, 8))   # batch tile (rows per grid step)
    b_p = _round_up(batch, tb)

    obs_p = _pad2d(obs.astype(jnp.float32), b_p, od_p).astype(compute_dtype)
    w1o_p = _pad2d(w1[:obs_dim], od_p, h1_p).astype(compute_dtype)
    b1_p = _pad2d(b1.reshape(1, -1), 1, h1_p).astype(jnp.float32)
    w2_p = _pad2d(w2, h1_p, h2_p).astype(compute_dtype)
    b2_p = _pad2d(b2.reshape(1, -1), 1, h2_p).astype(jnp.float32)
    w3_p = _pad2d(w3, h2_p, ad_p).astype(compute_dtype)
    b3_p = _pad2d(b3.reshape(1, -1), 1, ad_p).astype(jnp.float32)

    def act_spec(feat):                       # streamed over the batch grid
        return pl.BlockSpec((tb, feat), lambda i: (i, 0))

    def res_spec(a):                          # resident in VMEM across grid steps
        return pl.BlockSpec(a.shape, lambda i: (0, 0))

    operands = [obs_p]
    in_specs = [act_spec(od_p)]
    if has_goal:
        goal_p = _pad2d(goal.astype(jnp.float32), b_p, gd_p).astype(compute_dtype)
        w1g_p = _pad2d(w1[obs_dim:obs_dim + goal_dim], gd_p, h1_p).astype(compute_dtype)
        operands += [goal_p, w1o_p, w1g_p]
        in_specs += [act_spec(gd_p), res_spec(w1o_p), res_spec(w1g_p)]
    else:
        operands += [w1o_p]
        in_specs += [res_spec(w1o_p)]
    operands += [b1_p, w2_p, b2_p, w3_p, b3_p]
    in_specs += [res_spec(b1_p), res_spec(w2_p), res_spec(b2_p),
                 res_spec(w3_p), res_spec(b3_p)]

    kernel = functools.partial(actor_kernel, float(act_limit), has_goal)

    # --- advisory cost estimate (unpadded math) ---
    in_dim = obs_dim + goal_dim
    cbytes = jnp.dtype(compute_dtype).itemsize
    flops = 2 * batch * (in_dim * h1 + h1 * h2 + h2 * act_dim)
    bytes_accessed = (b_p * (od_p + gd_p) * cbytes                       # activations in
                      + ((od_p + gd_p) * h1_p + h1_p * h2_p + h2_p * ad_p) * cbytes
                      + 4 * (h1_p + h2_p + ad_p)                         # biases
                      + b_p * ad_p * 4)                                  # output
    cost = pl.CostEstimate(flops=flops, transcendentals=batch * act_dim,
                           bytes_accessed=bytes_accessed)

    # --- VMEM budget: resident weights + double-buffered activation/output tiles ---
    w_bytes = (((od_p + gd_p) * h1_p + h1_p * h2_p + h2_p * ad_p) * cbytes
               + 4 * (h1_p + h2_p + ad_p))
    blk_bytes = tb * (od_p + gd_p) * cbytes + tb * ad_p * 4
    vmem_limit = int(min(100 << 20, max(16 << 20, 2 * (w_bytes + blk_bytes) + (4 << 20))))

    out = pl.pallas_call(
        kernel,
        out_shape=jax.ShapeDtypeStruct((b_p, ad_p), jnp.float32),
        grid=(b_p // tb,),
        in_specs=in_specs,
        out_specs=pl.BlockSpec((tb, ad_p), lambda i: (i, 0)),
        compiler_params=pltpu.CompilerParams(
            dimension_semantics=("parallel",),   # uses both TCs on v7x
            vmem_limit_bytes=vmem_limit),
        cost_estimate=cost,
    )(*operands)

    return out[:batch, :act_dim]


def init_params(key, sizes):
    """Deterministic init of Linear layers; weights stored as (in, out)."""
    params = []
    for j in range(len(sizes) - 1):
        key, kw, kb = jax.random.split(key, 3)
        bound = 1.0 / jnp.sqrt(sizes[j])
        w = jax.random.uniform(kw, (sizes[j], sizes[j + 1]),
                               minval=-bound, maxval=bound, dtype=jnp.float32)
        b = jax.random.uniform(kb, (1, sizes[j + 1]),
                               minval=-bound, maxval=bound, dtype=jnp.float32)
        params.append((w, b))
    return params


def reference_forward(obs, goal, params, act_limit):
    """Pure-JAX reference matching the PyTorch module semantics."""
    if goal is None:
        goal = jnp.zeros(obs.shape[:-1] + (0,), dtype=obs.dtype)
    h = jnp.concatenate([obs, goal], axis=-1)
    (w1, b1), (w2, b2), (w3, b3) = params
    h = jnp.maximum(h @ w1 + b1, 0.0)
    h = jnp.maximum(h @ w2 + b2, 0.0)
    return act_limit * jnp.tanh(h @ w3 + b3)


if __name__ == "__main__":
    # Small, module-consistent shapes.
    batch = 2
    obs_dim = 12
    goal_dim = 4
    hidden_sizes = (32, 32)
    act_dim = 8
    act_limit = 2.0

    key = jax.random.PRNGKey(0)
    key, k_obs, k_goal, k_params = jax.random.split(key, 4)

    obs = jax.random.normal(k_obs, (batch, obs_dim), dtype=jnp.float32)
    goal = jax.random.normal(k_goal, (batch, goal_dim), dtype=jnp.float32)

    pi_sizes = [obs_dim + goal_dim] + list(hidden_sizes) + [act_dim]
    params = init_params(k_params, pi_sizes)
    ref = reference_forward(obs, goal, params, act_limit)

    # fp32 matmul path: tight tolerance against the fp32 reference.
    out_f32 = mlp_general_actor_forward(obs, goal, params, act_limit,
                                        compute_dtype=jnp.float32)
    out_f32 = jax.block_until_ready(out_f32)
    assert out_f32.shape == (batch, act_dim)
    assert jnp.allclose(out_f32, ref, atol=2e-5, rtol=2e-5), \
        float(jnp.max(jnp.abs(out_f32 - ref)))

    # bf16 matmul path (fp32 accumulate + fp32 epilogue): looser tolerance.
    out_bf16 = mlp_general_actor_forward(obs, goal, params, act_limit,
                                         compute_dtype=jnp.bfloat16)
    out_bf16 = jax.block_until_ready(out_bf16)
    assert jnp.allclose(out_bf16, ref, atol=5e-2, rtol=5e-2), \
        float(jnp.max(jnp.abs(out_bf16 - ref)))

    # goal=None path (goal_dim == 0): the goal matmul is statically skipped.
    pi_sizes_ng = [obs_dim] + list(hidden_sizes) + [act_dim]
    params_ng = init_params(k_params, pi_sizes_ng)
    out_ng = mlp_general_actor_forward(obs, None, params_ng, act_limit,
                                       compute_dtype=jnp.float32)
    out_ng = jax.block_until_ready(out_ng)
    ref_ng = reference_forward(obs, None, params_ng, act_limit)
    assert jnp.allclose(out_ng, ref_ng, atol=2e-5, rtol=2e-5)

    print("KERNEL_OK")
</pallas_src>

<mosaic_0001>
module attributes {stable_mosaic.version = 11 : i64} {
  func.func @actor_kernel(%arg0: i32, %arg1: memref<8x128xf32, #tpu.memory_space<vmem>>, %arg2: memref<8x128xf32, #tpu.memory_space<vmem>>, %arg3: memref<128x128xf32, #tpu.memory_space<vmem>>, %arg4: memref<128x128xf32, #tpu.memory_space<vmem>>, %arg5: memref<1x128xf32, #tpu.memory_space<vmem>>, %arg6: memref<128x128xf32, #tpu.memory_space<vmem>>, %arg7: memref<1x128xf32, #tpu.memory_space<vmem>>, %arg8: memref<128x128xf32, #tpu.memory_space<vmem>>, %arg9: memref<1x128xf32, #tpu.memory_space<vmem>>, %arg10: memref<8x128xf32, #tpu.memory_space<vmem>>) attributes {dimension_semantics = [#tpu.dimension_semantics<parallel>], iteration_bounds = array<i64: 1>, scalar_prefetch = 0 : i64, scratch_operands = 0 : i64, tpu.core_type = #tpu.core_type<tc>, window_params = [{transform_indices = @transform_0, window_bounds = array<i64: 8, 128>}, {transform_indices = @transform_1, window_bounds = array<i64: 8, 128>}, {pipeline_mode = #tpu.pipeline_mode<synchronous>, transform_indices = @transform_2, window_bounds = array<i64: 128, 128>}, {pipeline_mode = #tpu.pipeline_mode<synchronous>, transform_indices = @transform_3, window_bounds = array<i64: 128, 128>}, {pipeline_mode = #tpu.pipeline_mode<synchronous>, transform_indices = @transform_4, window_bounds = array<i64: 1, 128>}, {pipeline_mode = #tpu.pipeline_mode<synchronous>, transform_indices = @transform_5, window_bounds = array<i64: 128, 128>}, {pipeline_mode = #tpu.pipeline_mode<synchronous>, transform_indices = @transform_6, window_bounds = array<i64: 1, 128>}, {pipeline_mode = #tpu.pipeline_mode<synchronous>, transform_indices = @transform_7, window_bounds = array<i64: 128, 128>}, {pipeline_mode = #tpu.pipeline_mode<synchronous>, transform_indices = @transform_8, window_bounds = array<i64: 1, 128>}, {transform_indices = @transform_9, window_bounds = array<i64: 8, 128>}]} {
    %c0 = arith.constant 0 : index
    %c0_0 = arith.constant 0 : index
    %0 = vector.load %arg1[%c0, %c0_0] : memref<8x128xf32, #tpu.memory_space<vmem>>, vector<8x128xf32>
    %c0_1 = arith.constant 0 : index
    %c0_2 = arith.constant 0 : index
    %1 = vector.load %arg3[%c0_1, %c0_2] : memref<128x128xf32, #tpu.memory_space<vmem>>, vector<128x128xf32>
    %cst = arith.constant dense<0.000000e+00> : vector<8x128xf32>
    %2 = tpu.matmul %0, %1, %cst {dimension_numbers = #tpu.dot_dimension_numbers<[1], [0], [0], [1], [0, 0, 1, 1], [], []>} : vector<8x128xf32>, vector<128x128xf32>, vector<8x128xf32> -> vector<8x128xf32>
    %c0_3 = arith.constant 0 : index
    %c0_4 = arith.constant 0 : index
    %3 = vector.load %arg2[%c0_3, %c0_4] : memref<8x128xf32, #tpu.memory_space<vmem>>, vector<8x128xf32>
    %c0_5 = arith.constant 0 : index
    %c0_6 = arith.constant 0 : index
    %4 = vector.load %arg4[%c0_5, %c0_6] : memref<128x128xf32, #tpu.memory_space<vmem>>, vector<128x128xf32>
    %cst_7 = arith.constant dense<0.000000e+00> : vector<8x128xf32>
    %5 = tpu.matmul %3, %4, %cst_7 {dimension_numbers = #tpu.dot_dimension_numbers<[1], [0], [0], [1], [0, 0, 1, 1], [], []>} : vector<8x128xf32>, vector<128x128xf32>, vector<8x128xf32> -> vector<8x128xf32>
    %6 = arith.addf %2, %5 : vector<8x128xf32>
    %c0_8 = arith.constant 0 : index
    %c0_9 = arith.constant 0 : index
    %7 = vector.load %arg5[%c0_8, %c0_9] : memref<1x128xf32, #tpu.memory_space<vmem>>, vector<1x128xf32>
    %8 = vector.broadcast %7 : vector<1x128xf32> to vector<8x128xf32>
    %9 = arith.addf %6, %8 : vector<8x128xf32>
    %cst_10 = arith.constant 0.000000e+00 : f32
    %10 = vector.broadcast %cst_10 : f32 to vector<8x128xf32>
    %11 = arith.maximumf %9, %10 : vector<8x128xf32>
    %c0_11 = arith.constant 0 : index
    %c0_12 = arith.constant 0 : index
    %12 = vector.load %arg6[%c0_11, %c0_12] : memref<128x128xf32, #tpu.memory_space<vmem>>, vector<128x128xf32>
    %cst_13 = arith.constant dense<0.000000e+00> : vector<8x128xf32>
    %13 = tpu.matmul %11, %12, %cst_13 {dimension_numbers = #tpu.dot_dimension_numbers<[1], [0], [0], [1], [0, 0, 1, 1], [], []>} : vector<8x128xf32>, vector<128x128xf32>, vector<8x128xf32> -> vector<8x128xf32>
    %c0_14 = arith.constant 0 : index
    %c0_15 = arith.constant 0 : index
    %14 = vector.load %arg7[%c0_14, %c0_15] : memref<1x128xf32, #tpu.memory_space<vmem>>, vector<1x128xf32>
    %15 = vector.broadcast %14 : vector<1x128xf32> to vector<8x128xf32>
    %16 = arith.addf %13, %15 : vector<8x128xf32>
    %cst_16 = arith.constant 0.000000e+00 : f32
    %17 = vector.broadcast %cst_16 : f32 to vector<8x128xf32>
    %18 = arith.maximumf %16, %17 : vector<8x128xf32>
    %c0_17 = arith.constant 0 : index
    %c0_18 = arith.constant 0 : index
    %19 = vector.load %arg8[%c0_17, %c0_18] : memref<128x128xf32, #tpu.memory_space<vmem>>, vector<128x128xf32>
    %cst_19 = arith.constant dense<0.000000e+00> : vector<8x128xf32>
    %20 = tpu.matmul %18, %19, %cst_19 {dimension_numbers = #tpu.dot_dimension_numbers<[1], [0], [0], [1], [0, 0, 1, 1], [], []>} : vector<8x128xf32>, vector<128x128xf32>, vector<8x128xf32> -> vector<8x128xf32>
    %c0_20 = arith.constant 0 : index
    %c0_21 = arith.constant 0 : index
    %21 = vector.load %arg9[%c0_20, %c0_21] : memref<1x128xf32, #tpu.memory_space<vmem>>, vector<1x128xf32>
    %22 = vector.broadcast %21 : vector<1x128xf32> to vector<8x128xf32>
    %23 = arith.addf %20, %22 : vector<8x128xf32>
    %24 = math.tanh %23 : vector<8x128xf32>
    %cst_22 = arith.constant 2.000000e+00 : f32
    %25 = vector.broadcast %cst_22 : f32 to vector<8x128xf32>
    %26 = arith.mulf %25, %24 : vector<8x128xf32>
    %c0_23 = arith.constant 0 : index
    %c0_24 = arith.constant 0 : index
    %27 = vector.load %arg10[%c0_23, %c0_24] : memref<8x128xf32, #tpu.memory_space<vmem>>, vector<8x128xf32>
    tpu.vector_store %arg10[%c0_23, %c0_24], %26 {strides = array<i32>} : memref<8x128xf32, #tpu.memory_space<vmem>>, vector<8x128xf32>,
    return
  }
  func.func @transform_0(%arg0: i32) -> (i32, i32) {
    %c0_i32 = arith.constant 0 : i32
    %c0_i32_0 = arith.constant 0 : i32
    return %arg0, %c0_i32 : i32, i32
  }
  func.func @transform_1(%arg0: i32) -> (i32, i32) {
    %c0_i32 = arith.constant 0 : i32
    %c0_i32_0 = arith.constant 0 : i32
    return %arg0, %c0_i32 : i32, i32
  }
  func.func @transform_2(%arg0: i32) -> (i32, i32) {
    %c0_i32 = arith.constant 0 : i32
    %c0_i32_0 = arith.constant 0 : i32
    %c0_i32_1 = arith.constant 0 : i32
    return %c0_i32, %c0_i32_0 : i32, i32
  }
  func.func @transform_3(%arg0: i32) -> (i32, i32) {
    %c0_i32 = arith.constant 0 : i32
    %c0_i32_0 = arith.constant 0 : i32
    %c0_i32_1 = arith.constant 0 : i32
    return %c0_i32, %c0_i32_0 : i32, i32
  }
  func.func @transform_4(%arg0: i32) -> (i32, i32) {
    %c0_i32 = arith.constant 0 : i32
    %c0_i32_0 = arith.constant 0 : i32
    %c0_i32_1 = arith.constant 0 : i32
    return %c0_i32, %c0_i32_0 : i32, i32
  }
  func.func @transform_5(%arg0: i32) -> (i32, i32) {
    %c0_i32 = arith.constant 0 : i32
    %c0_i32_0 = arith.constant 0 : i32
    %c0_i32_1 = arith.constant 0 : i32
    return %c0_i32, %c0_i32_0 : i32, i32
  }
  func.func @transform_6(%arg0: i32) -> (i32, i32) {
    %c0_i32 = arith.constant 0 : i32
    %c0_i32_0 = arith.constant 0 : i32
    %c0_i32_1 = arith.constant 0 : i32
    return %c0_i32, %c0_i32_0 : i32, i32
  }
  func.func @transform_7(%arg0: i32) -> (i32, i32) {
    %c0_i32 = arith.constant 0 : i32
    %c0_i32_0 = arith.constant 0 : i32
    %c0_i32_1 = arith.constant 0 : i32
    return %c0_i32, %c0_i32_0 : i32, i32
  }
  func.func @transform_8(%arg0: i32) -> (i32, i32) {
    %c0_i32 = arith.constant 0 : i32
    %c0_i32_0 = arith.constant 0 : i32
    %c0_i32_1 = arith.constant 0 : i32
    return %c0_i32, %c0_i32_0 : i32, i32
  }
  func.func @transform_9(%arg0: i32) -> (i32, i32) {
    %c0_i32 = arith.constant 0 : i32
    %c0_i32_0 = arith.constant 0 : i32
    return %arg0, %c0_i32 : i32, i32
  }
}

</mosaic_0001>

<bundles_post_ra>
// kernel: tpu_custom_call.1
= control target key start
LH: loop header
LB: loop body
LE: loop exit
PB: predicated region body
PF: predicated region fallthrough
CT: control target
= control target key end

     0   :  { %14 = vsyncpa [#allocation3], 0  ;;  %s1051_s0 = inlined_call_operand.hbm [shape: f32[8,128], index: 0, kind: input, shape index: {}]   ;;  %s1052_s1 = inlined_call_operand.hbm [shape: f32[8,128], index: 1, kind: input, shape index: {}]   ;;  %s1053_s2 = inlined_call_operand.hbm [shape: f32[128,128], index: 2, kind: input, shape index: {}]   ;;  %s1054_s3 = inlined_call_operand.hbm [shape: f32[128,128], index: 3, kind: input, shape index: {}]   ;;  %s1055_s4 = inlined_call_operand.vmem [shape: f32[1,128], index: 4, kind: input, shape index: {}]   ;;  %s1056_s5 = inlined_call_operand.hbm [shape: f32[128,128], index: 5, kind: input, shape index: {}]   ;;  %s1057_s6 = inlined_call_operand.vmem [shape: f32[1,128], index: 6, kind: input, shape index: {}]   ;;  %s1058_s7 = inlined_call_operand.hbm [shape: f32[128,128], index: 7, kind: input, shape index: {}]   ;;  %s1059_s8 = inlined_call_operand.vmem [shape: f32[1,128], index: 8, kind: input, shape index: {}]   ;;  %s1060_s9 = inlined_call_operand.hbm [shape: f32[8,128], index: 9, kind: output, shape index: {}]  }
   0x1   :  { %15 = vsyncpa [#allocation6], 0 }
   0x2   :  { %16 = vsyncpa [#allocation9], 0 }
   0x3   :  { %17 = vsyncpa [#allocation12], 0 }
   0x4   :  { %18 = vsyncpa [#allocation4], 0  ;;  %s876_s30 = smov [#allocation5]  }
   0x5   :  { %s35_s10 = sshll.u32 %s876_s30, 4  ;;  %s36_s10 = int_to_ptr.vmem [resolvable:$true] %s35_s10 }
   0x6   :  { %s734_s11 = scalar_lea.vmem %s36_s10, 128  ;;  %p739_p1 = scmp.lt.s32.totalorder %s36_s10, %s36_s10 }
   0x7   :  { %p735_p0 = scmp.ne.s32.totalorder %s36_s10, %s734_s11  ;;  %p740_p2 = scmp.lt.s32.totalorder %s734_s11, %s734_s11 }
   0x9   :  { %p741_p3 = por %p740_p2, %p739_p1 }
   0xb   :  { %p742_p4 = pnand %p741_p3, %p735_p0 }
   0xd   :  { %745 = shalt.err (!%p742_p4)
}
   0xe   :  { %38 = dma.hbm_to_vmem [thread:$0]  %s1052_s1, 128, %s36_s10, [#allocation6]  }
   0xf   :  { %s877_s14 = smov [#allocation8]   ;;  %s878_s16 = smov [#allocation2]  }
  0x10   :  { %s56_s15 = sshll.u32 %s877_s14, 4  ;;  %s25_s17 = sshll.u32 %s878_s16, 4  ;;  %s57_s15 = int_to_ptr.vmem [resolvable:$true] %s56_s15  ;;  %s26_s17 = int_to_ptr.vmem [resolvable:$true] %s25_s17 }
  0x11   :  { %s754_s18 = scalar_lea.vmem %s57_s15, 2048  ;;  %p759_p6 = scmp.lt.s32.totalorder %s57_s15, %s57_s15 }
  0x12   :  { %p755_p5 = scmp.ne.s32.totalorder %s57_s15, %s754_s18  ;;  %p760_p7 = scmp.lt.s32.totalorder %s754_s18, %s754_s18 }
  0x14   :  { %p761_p8 = por %p760_p7, %p759_p6 }
  0x16   :  { %p762_p9 = pnand %p761_p8, %p755_p5 }
  0x18   :  { %765 = shalt.err (!%p762_p9)
}
  0x19   :  { %s879_s19 = smov 128   ;;  %s880_s20 = smov 8  }
  0x1a   :  { %62 = dma.hbm_to_vmem [thread:$0]  %s1054_s3, 2048, %s57_s15, [#allocation9], %s879_s19, %s879_s19, %s880_s20  }
  0x1b   :  { %s774_s1 = scalar_lea.vmem %s26_s17, 128  ;;  %p779_p11 = scmp.lt.s32.totalorder %s26_s17, %s26_s17 }
  0x1c   :  { %p775_p10 = scmp.ne.s32.totalorder %s26_s17, %s774_s1  ;;  %p780_p12 = scmp.lt.s32.totalorder %s774_s1, %s774_s1 }
  0x1e   :  { %p781_p13 = por %p780_p12, %p779_p11 }
  0x20   :  { %p782_p0 = pnand %p781_p13, %p775_p10 }
  0x22   :  { %785 = shalt.err (!%p782_p0)
}
  0x23   :  { %28 = dma.hbm_to_vmem [thread:$0]  %s1051_s0, 128, %s26_s17, [#allocation3]  }
  0x24   :  { %s881_s25 = smov [#allocation7]   ;;  %s882_s27 = smov [#allocation10]  }
  0x25   :  { %s44_s26 = sshll.u32 %s881_s25, 4  ;;  %s70_s28 = sshll.u32 %s882_s27, 4  ;;  %s45_s26 = int_to_ptr.vmem [resolvable:$true] %s44_s26  ;;  %s71_s28 = int_to_ptr.vmem [resolvable:$true] %s70_s28 }
  0x26   :  { %s794_s29 = scalar_lea.vmem %s45_s26, 2048  ;;  %p799_p2 = scmp.lt.s32.totalorder %s45_s26, %s45_s26 }
  0x27   :  { %p795_p1 = scmp.ne.s32.totalorder %s45_s26, %s794_s29  ;;  %p800_p3 = scmp.lt.s32.totalorder %s794_s29, %s794_s29 }
  0x29   :  { %p801_p4 = por %p800_p3, %p799_p2 }
  0x2b   :  { %p802_p5 = pnand %p801_p4, %p795_p1 }
  0x2d   :  { %805 = shalt.err (!%p802_p5)
}
  0x2e   :  { %50 = dma.hbm_to_vmem [thread:$0]  %s1053_s2, 2048, %s45_s26, [#allocation6], %s879_s19, %s879_s19, %s880_s20  }
  0x2f   :  { %s814_s0 = scalar_lea.vmem %s71_s28, 2048  ;;  %p819_p7 = scmp.lt.s32.totalorder %s71_s28, %s71_s28 }
  0x30   :  { %p815_p6 = scmp.ne.s32.totalorder %s71_s28, %s814_s0  ;;  %p820_p8 = scmp.lt.s32.totalorder %s814_s0, %s814_s0 }
  0x32   :  { %p821_p9 = por %p820_p8, %p819_p7 }
  0x34   :  { %p822_p10 = pnand %p821_p9, %p815_p6 }
  0x36   :  { %825 = shalt.err (!%p822_p10)
}
  0x37   :  { %76 = dma.hbm_to_vmem [thread:$0]  %s1056_s5, 2048, %s71_s28, [#allocation9], %s879_s19, %s879_s19, %s880_s20  }
  0x38   :  { %s883_s12 = smov [#allocation11]  }
  0x39   :  { %s84_s13 = sshll.u32 %s883_s12, 4  ;;  %s85_s13 = int_to_ptr.vmem [resolvable:$true] %s84_s13 }
  0x3a   :  { %s834_s14 = scalar_lea.vmem %s85_s13, 2048  ;;  %p839_p12 = scmp.lt.s32.totalorder %s85_s13, %s85_s13 }
  0x3b   :  { %p835_p11 = scmp.ne.s32.totalorder %s85_s13, %s834_s14  ;;  %p840_p13 = scmp.lt.s32.totalorder %s834_s14, %s834_s14 }
  0x3d   :  { %p841_p0 = por %p840_p13, %p839_p12 }
  0x3f   :  { %p842_p1 = pnand %p841_p0, %p835_p11 }
  0x41   :  { %845 = shalt.err (!%p842_p1)
}
  0x42   :  { %90 = dma.hbm_to_vmem [thread:$0]  %s1058_s7, 2048, %s85_s13, [#allocation12], %s879_s19, %s879_s19, %s880_s20  }
  0x43   :  { %866 = dma.done.wait [#allocation3], 128  }
  0x44   :  { %867 = vsyncadd [#allocation3], 4294967168 }
  0x45   :  { %868 = dma.done.wait [#allocation6], 2176  }
  0x46   :  { %869 = vsyncadd [#allocation6], 4294965120 }
  0x47   :  { %870 = dma.done.wait [#allocation9], 4096  }
  0x48   :  { %871 = vsyncadd [#allocation9], 4294963200 }
  0x49   :  { %872 = dma.done.wait [#allocation12], 2048  }
  0x4a   :  { %873 = vsyncadd [#allocation12], 4294965248  ;;  %v884_v0 = vmov 0.0   ;;  %vm885_vm0 = vmmov 0   ;;  %v144_v1 = vld [vmem:[#allocation8 + $0x78] sm:$0xff]  ;;  %v143_v3 = vld [vmem:[#allocation8 + $0x70] sm:$0xff] }
  0x4b   :  { %573 = vmatprep.subr.mxu0 %v884_v0  ;;  %608 = vmatprep.subr.mxu1 %v884_v0  ;;  %v127_v2 = vld [vmem:[#allocation7 + $0x78] sm:$0xff]  ;;  %v126_v4 = vld [vmem:[#allocation7 + $0x70] sm:$0xff]  ;;  %v142_v5 = vld [vmem:[#allocation8 + $0x68] sm:$0xff]  ;;  %s886_s19 = smov [#allocation13]  }
  0x4c   :  { %605 = vmatprep.mubr.msk.f32.mxu0 %vm885_vm0, %v884_v0  ;;  %640 = vmatprep.mubr.msk.f32.mxu1 %vm885_vm0, %v884_v0  ;;  %v125_v6 = vld [vmem:[#allocation7 + $0x68] sm:$0xff]  ;;  %v141_v7 = vld [vmem:[#allocation8 + $0x60] sm:$0xff]  ;;  %v140_v9 = vld [vmem:[#allocation8 + $0x58] sm:$0xff]  ;;  %s490_s20 = sshll.u32 %s886_s19, 4  ;;  %s491_s20 = int_to_ptr.vmem [resolvable:$true] %s490_s20 }
  0x4d   :  { %574 = vmatpush3.msra.mxu0 %v144_v1  ;;  %609 = vmatpush3.msra.mxu1 %v127_v2  ;;  %v124_v8 = vld [vmem:[#allocation7 + $0x60] sm:$0xff]  ;;  %v123_v10 = vld [vmem:[#allocation7 + $0x58] sm:$0xff]  ;;  %v139_v11 = vld [vmem:[#allocation8 + $0x50] sm:$0xff]  ;;  %p851_p3 = scmp.lt.s32.totalorder %s491_s20, %s491_s20 }
  0x4e   :  { %575 = vmatprep.subr.mxu0 %v884_v0  ;;  %610 = vmatprep.subr.mxu1 %v884_v0  ;;  %v122_v12 = vld [vmem:[#allocation7 + $0x50] sm:$0xff]  ;;  %v138_v13 = vld [vmem:[#allocation8 + $0x48] sm:$0xff]  ;;  %v137_v15 = vld [vmem:[#allocation8 + $0x40] sm:$0xff] }
  0x4f   :  { %576 = vmatpush3.msra.mxu0 %v143_v3  ;;  %611 = vmatpush3.msra.mxu1 %v126_v4  ;;  %v121_v14 = vld [vmem:[#allocation7 + $0x48] sm:$0xff]  ;;  %v120_v16 = vld [vmem:[#allocation7 + $0x40] sm:$0xff]  ;;  %v136_v17 = vld [vmem:[#allocation8 + $0x38] sm:$0xff] }
  0x50   :  { %577 = vmatprep.subr.mxu0 %v884_v0  ;;  %612 = vmatprep.subr.mxu1 %v884_v0  ;;  %v119_v18 = vld [vmem:[#allocation7 + $0x38] sm:$0xff]  ;;  %v135_v19 = vld [vmem:[#allocation8 + $0x30] sm:$0xff]  ;;  %v134_v21 = vld [vmem:[#allocation8 + $0x28] sm:$0xff] }
  0x51   :  { %578 = vmatpush3.msra.mxu0 %v142_v5  ;;  %613 = vmatpush3.msra.mxu1 %v125_v6  ;;  %v118_v20 = vld [vmem:[#allocation7 + $0x30] sm:$0xff]  ;;  %v117_v22 = vld [vmem:[#allocation7 + $0x28] sm:$0xff]  ;;  %v133_v23 = vld [vmem:[#allocation8 + $0x20] sm:$0xff] }
  0x52   :  { %579 = vmatprep.subr.mxu0 %v884_v0  ;;  %614 = vmatprep.subr.mxu1 %v884_v0  ;;  %v116_v24 = vld [vmem:[#allocation7 + $0x20] sm:$0xff]  ;;  %v132_v25 = vld [vmem:[#allocation8 + $0x18] sm:$0xff]  ;;  %v131_v27 = vld [vmem:[#allocation8 + $0x10] sm:$0xff] }
  0x53   :  { %580 = vmatpush3.msra.mxu0 %v141_v7  ;;  %615 = vmatpush3.msra.mxu1 %v124_v8  ;;  %v115_v26 = vld [vmem:[#allocation7 + $0x18] sm:$0xff]  ;;  %v114_v28 = vld [vmem:[#allocation7 + $0x10] sm:$0xff]  ;;  %v130_v29 = vld [vmem:[#allocation8 + $0x8] sm:$0xff] }
  0x54   :  { %581 = vmatprep.subr.mxu0 %v884_v0  ;;  %616 = vmatprep.subr.mxu1 %v884_v0  ;;  %v113_v30 = vld [vmem:[#allocation7 + $0x8] sm:$0xff]  ;;  %v129_v31 = vld [vmem:[#allocation8] sm:$0xff]  ;;  %v128_v33 = vld [vmem:[#allocation5] sm:$0xff] }
  0x55   :  { %582 = vmatpush3.msra.mxu0 %v140_v9  ;;  %617 = vmatpush3.msra.mxu1 %v123_v10  ;;  %v112_v32 = vld [vmem:[#allocation7] sm:$0xff]  ;;  %v111_v34 = vld [vmem:[#allocation2] sm:$0xff]  ;;  %v309_v35 = vld [vmem:[#allocation10 + $0x78] sm:$0xff] }
  0x56   :  { %583 = vmatprep.subr.mxu0 %v884_v0  ;;  %618 = vmatprep.subr.mxu1 %v884_v0  ;;  %v308_v36 = vld [vmem:[#allocation10 + $0x70] sm:$0xff]  ;;  %v307_v37 = vld [vmem:[#allocation10 + $0x68] sm:$0xff]  ;;  %v306_v38 = vld [vmem:[#allocation10 + $0x60] sm:$0xff] }
  0x57   :  { %584 = vmatpush3.msra.mxu0 %v139_v11  ;;  %619 = vmatpush3.msra.mxu1 %v122_v12  ;;  %v305_v39 = vld [vmem:[#allocation10 + $0x58] sm:$0xff]  ;;  %v304_v40 = vld [vmem:[#allocation10 + $0x50] sm:$0xff]  ;;  %v303_v41 = vld [vmem:[#allocation10 + $0x48] sm:$0xff] }
  0x58   :  { %585 = vmatprep.subr.mxu0 %v884_v0  ;;  %620 = vmatprep.subr.mxu1 %v884_v0  ;;  %v302_v42 = vld [vmem:[#allocation10 + $0x40] sm:$0xff]  ;;  %v301_v43 = vld [vmem:[#allocation10 + $0x38] sm:$0xff]  ;;  %v300_v44 = vld [vmem:[#allocation10 + $0x30] sm:$0xff] }
  0x59   :  { %586 = vmatpush3.msra.mxu0 %v138_v13  ;;  %621 = vmatpush3.msra.mxu1 %v121_v14  ;;  %v299_v45 = vld [vmem:[#allocation10 + $0x28] sm:$0xff]  ;;  %v298_v46 = vld [vmem:[#allocation10 + $0x20] sm:$0xff]  ;;  %v297_v47 = vld [vmem:[#allocation10 + $0x18] sm:$0xff] }
  0x5a   :  { %587 = vmatprep.subr.mxu0 %v884_v0  ;;  %622 = vmatprep.subr.mxu1 %v884_v0  ;;  %v296_v48 = vld [vmem:[#allocation10 + $0x10] sm:$0xff]  ;;  %v295_v49 = vld [vmem:[#allocation10 + $0x8] sm:$0xff]  ;;  %v294_v50 = vld [vmem:[#allocation10] sm:$0xff] }
  0x5b   :  { %588 = vmatpush3.msra.mxu0 %v137_v15  ;;  %623 = vmatpush3.msra.mxu1 %v120_v16  ;;  %v403_v51 = vld [vmem:[#allocation11 + $0x78] sm:$0xff]  ;;  %v402_v52 = vld [vmem:[#allocation11 + $0x70] sm:$0xff]  ;;  %v401_v53 = vld [vmem:[#allocation11 + $0x68] sm:$0xff] }
  0x5c   :  { %589 = vmatprep.subr.mxu0 %v884_v0  ;;  %624 = vmatprep.subr.mxu1 %v884_v0  ;;  %v400_v54 = vld [vmem:[#allocation11 + $0x60] sm:$0xff]  ;;  %v399_v55 = vld [vmem:[#allocation11 + $0x58] sm:$0xff]  ;;  %v398_v56 = vld [vmem:[#allocation11 + $0x50] sm:$0xff] }
  0x5d   :  { %590 = vmatpush3.msra.mxu0 %v136_v17  ;;  %625 = vmatpush3.msra.mxu1 %v119_v18  ;;  %v397_v57 = vld [vmem:[#allocation11 + $0x48] sm:$0xff]  ;;  %v396_v58 = vld [vmem:[#allocation11 + $0x40] sm:$0xff]  ;;  %v395_v59 = vld [vmem:[#allocation11 + $0x38] sm:$0xff] }
  0x5e   :  { %591 = vmatprep.subr.mxu0 %v884_v0  ;;  %626 = vmatprep.subr.mxu1 %v884_v0  ;;  %v394_v60 = vld [vmem:[#allocation11 + $0x30] sm:$0xff]  ;;  %v393_v61 = vld [vmem:[#allocation11 + $0x28] sm:$0xff]  ;;  %v392_v62 = vld [vmem:[#allocation11 + $0x20] sm:$0xff] }
  0x5f   :  { %592 = vmatpush3.msra.mxu0 %v135_v19  ;;  %627 = vmatpush3.msra.mxu1 %v118_v20  ;;  %v391_v63 = vld [vmem:[#allocation11 + $0x18] sm:$0xff]  ;;  %v502_v3 = vld [vmem:[%s1055_s4] ss:$0 sm:$0xff]  ;;  %v389_v10 = vld [vmem:[#allocation11 + $0x8] sm:$0xff] }
  0x60   :  { %593 = vmatprep.subr.mxu0 %v884_v0  ;;  %628 = vmatprep.subr.mxu1 %v884_v0  ;;  %v390_v9 = vld [vmem:[#allocation11 + $0x10] sm:$0xff]  ;;  %v388_v11 = vld [vmem:[#allocation11] sm:$0xff] }
  0x61   :  { %594 = vmatpush3.msra.mxu0 %v134_v21  ;;  %629 = vmatpush3.msra.mxu1 %v117_v22  ;;  %v503_v12 = vld [vmem:[%s1057_s6] ss:$0 sm:$0xff]  ;;  %s846_s6 = scalar_lea.vmem %s491_s20, 128 }
  0x62   :  { %595 = vmatprep.subr.mxu0 %v884_v0  ;;  %630 = vmatprep.subr.mxu1 %v884_v0  ;;  %v504_v17 = vld [vmem:[%s1059_s8] ss:$0 sm:$0xff]  ;;  %p847_p2 = scmp.ne.s32.totalorder %s491_s20, %s846_s6  ;;  %p852_p4 = scmp.lt.s32.totalorder %s846_s6, %s846_s6 }
  0x63   :  { %596 = vmatpush3.msra.mxu0 %v133_v23  ;;  %631 = vmatpush3.msra.mxu1 %v116_v24 }
  0x64   :  { %597 = vmatprep.subr.mxu0 %v884_v0  ;;  %632 = vmatprep.subr.mxu1 %v884_v0  ;;  %p853_p5 = por %p852_p4, %p851_p3 }
  0x65   :  { %598 = vmatpush3.msra.mxu0 %v132_v25  ;;  %633 = vmatpush3.msra.mxu1 %v115_v26 }
  0x66   :  { %599 = vmatprep.subr.mxu0 %v884_v0  ;;  %634 = vmatprep.subr.mxu1 %v884_v0  ;;  %p854_p6 = pnand %p853_p5, %p847_p2 }
  0x67   :  { %600 = vmatpush3.msra.mxu0 %v131_v27  ;;  %635 = vmatpush3.msra.mxu1 %v114_v28 }
  0x68   :  { %601 = vmatprep.subr.mxu0 %v884_v0  ;;  %636 = vmatprep.subr.mxu1 %v884_v0 }
  0x69   :  { %602 = vmatpush3.msra.mxu0 %v130_v29  ;;  %637 = vmatpush3.msra.mxu1 %v113_v30 }
  0x6a   :  { %603 = vmatprep.subr.mxu0 %v884_v0  ;;  %638 = vmatprep.subr.mxu1 %v884_v0 }
  0x6b   :  { %604 = vmatpush3.msra.mxu0 %v129_v31  ;;  %639 = vmatpush3.msra.mxu1 %v112_v32 }
  0x6c   :  { %606 = vmatmul.mubr.f32.vlgmr.msra.gmra.mxu0 %v128_v33  ;;  %641 = vmatmul.mubr.f32.vlgmr.msra.gmra.mxu1 %v111_v34 }
  0x6d   :  { %643 = vmatprep.subr.mxu0 %v884_v0  ;;  %675 = vmatprep.mubr.msk.f32.mxu0 %vm885_vm0, %v884_v0 }
  0x6e   :  { %644 = vmatpush3.msra.mxu0 %v309_v35  ;;  %678 = vmatprep.subr.mxu1 %v884_v0 }
  0x6f   :  { %645 = vmatprep.subr.mxu0 %v884_v0  ;;  %710 = vmatprep.mubr.msk.f32.mxu1 %vm885_vm0, %v884_v0 }
  0x70   :  { %646 = vmatpush3.msra.mxu0 %v308_v36  ;;  %679 = vmatpush3.msra.mxu1 %v403_v51 }
  0x71   :  { %647 = vmatprep.subr.mxu0 %v884_v0  ;;  %680 = vmatprep.subr.mxu1 %v884_v0 }
  0x72   :  { %648 = vmatpush3.msra.mxu0 %v307_v37  ;;  %681 = vmatpush3.msra.mxu1 %v402_v52 }
  0x73   :  { %649 = vmatprep.subr.mxu0 %v884_v0  ;;  %682 = vmatprep.subr.mxu1 %v884_v0 }
  0x74   :  { %650 = vmatpush3.msra.mxu0 %v306_v38  ;;  %683 = vmatpush3.msra.mxu1 %v401_v53 }
  0x75   :  { %651 = vmatprep.subr.mxu0 %v884_v0  ;;  %684 = vmatprep.subr.mxu1 %v884_v0 }
  0x76   :  { %652 = vmatpush3.msra.mxu0 %v305_v39  ;;  %685 = vmatpush3.msra.mxu1 %v400_v54 }
  0x77   :  { %653 = vmatprep.subr.mxu0 %v884_v0  ;;  %686 = vmatprep.subr.mxu1 %v884_v0 }
  0x78   :  { %654 = vmatpush3.msra.mxu0 %v304_v40  ;;  %687 = vmatpush3.msra.mxu1 %v399_v55 }
  0x79   :  { %655 = vmatprep.subr.mxu0 %v884_v0  ;;  %688 = vmatprep.subr.mxu1 %v884_v0 }
  0x7a   :  { %656 = vmatpush3.msra.mxu0 %v303_v41  ;;  %689 = vmatpush3.msra.mxu1 %v398_v56 }
  0x7b   :  { %657 = vmatprep.subr.mxu0 %v884_v0  ;;  %690 = vmatprep.subr.mxu1 %v884_v0 }
  0x7c   :  { %658 = vmatpush3.msra.mxu0 %v302_v42  ;;  %691 = vmatpush3.msra.mxu1 %v397_v57 }
  0x7d   :  { %659 = vmatprep.subr.mxu0 %v884_v0  ;;  %692 = vmatprep.subr.mxu1 %v884_v0 }
  0x7e   :  { %660 = vmatpush3.msra.mxu0 %v301_v43  ;;  %693 = vmatpush3.msra.mxu1 %v396_v58 }
  0x7f   :  { %661 = vmatprep.subr.mxu0 %v884_v0  ;;  %694 = vmatprep.subr.mxu1 %v884_v0 }
  0x80   :  { %662 = vmatpush3.msra.mxu0 %v300_v44  ;;  %695 = vmatpush3.msra.mxu1 %v395_v59 }
  0x81   :  { %663 = vmatprep.subr.mxu0 %v884_v0  ;;  %696 = vmatprep.subr.mxu1 %v884_v0 }
  0x82   :  { %664 = vmatpush3.msra.mxu0 %v299_v45  ;;  %697 = vmatpush3.msra.mxu1 %v394_v60 }
  0x83   :  { %665 = vmatprep.subr.mxu0 %v884_v0  ;;  %698 = vmatprep.subr.mxu1 %v884_v0 }
  0x84   :  { %666 = vmatpush3.msra.mxu0 %v298_v46  ;;  %699 = vmatpush3.msra.mxu1 %v393_v61 }
  0x85   :  { %667 = vmatprep.subr.mxu0 %v884_v0  ;;  %700 = vmatprep.subr.mxu1 %v884_v0 }
  0x86   :  { %668 = vmatpush3.msra.mxu0 %v297_v47  ;;  %701 = vmatpush3.msra.mxu1 %v392_v62 }
  0x87   :  { %669 = vmatprep.subr.mxu0 %v884_v0  ;;  %702 = vmatprep.subr.mxu1 %v884_v0 }
  0x88   :  { %670 = vmatpush3.msra.mxu0 %v296_v48  ;;  %703 = vmatpush3.msra.mxu1 %v391_v63 }
  0x89   :  { %671 = vmatprep.subr.mxu0 %v884_v0  ;;  %704 = vmatprep.subr.mxu1 %v884_v0 }
  0x8a   :  { %672 = vmatpush3.msra.mxu0 %v295_v49  ;;  %705 = vmatpush3.msra.mxu1 %v390_v9 }
  0x8b   :  { %673 = vmatprep.subr.mxu0 %v884_v0  ;;  %706 = vmatprep.subr.mxu1 %v884_v0 }
  0x8c   :  { %674 = vmatpush3.msra.mxu0 %v294_v50  ;;  %707 = vmatpush3.msra.mxu1 %v389_v10 }
  0x8d   :  { %708 = vmatprep.subr.mxu1 %v884_v0 }
  0x8e   :  { %709 = vmatpush3.msra.mxu1 %v388_v11 }
 0x12c   :  { %v211_v1 = vpop.f32.mrf.mxu0  ;;  %v281_v2 = vpop.f32.mrf.mxu1 }
 0x12d   :  { %v282_v4 = vadd.f32 %v281_v2, %v211_v1 }
 0x12e   :  { %v607_v5 = vpop.f32.mrf.mxu0  ;;  %v642_v6 = vpop.f32.mrf.mxu1 }
 0x12f   :  { %v292_v7 = vadd.f32 %v502_v3, %v282_v4 }
 0x131   :  { %v293_v8 = vmax.f32 %v292_v7, 0.0 }
 0x133   :  { %676 = vmatmul.mubr.f32.vlgmr.msra.gmra.mxu0 %v293_v8 }
 0x1f3   :  { %v383_v13 = vpop.f32.mrf.mxu0 }
 0x1f4   :  { %v384_v14 = vadd.f32 %v503_v12, %v383_v13 }
 0x1f5   :  { %v677_v15 = vpop.f32.mrf.mxu0 }
 0x1f6   :  { %v387_v16 = vmax.f32 %v384_v14, 0.0 }
 0x1f8   :  { %711 = vmatmul.mubr.f32.vlgmr.msra.gmra.mxu1 %v387_v16 }
 0x2b8   :  { %v477_v18 = vpop.f32.mrf.mxu1 }
 0x2b9   :  { %v478_v19 = vadd.f32 %v504_v17, %v477_v18 }
 0x2ba   :  { %v712_v20 = vpop.f32.mrf.mxu1 }
 0x2bb   :  { %724 = vtanh.f32 %v478_v19 }
 0x2c8   :  { %v725_v0 = vpop.eup %724 }
 0x2c9   :  { %v482_v21 = vmul.f32 2.0, %v725_v0 }
 0x2cb   :  { %483 = vst [vmem:[#allocation13] sm:$0xff] %v482_v21 }
 0x2cc   :  { %857 = shalt.err (!%p854_p6)
}
 0x2cd   :  { %493 = dma.vmem_to_hbm [thread:$0]  %s491_s20, 128, %s1060_s9, [#allocation4]  }
 0x2ce   :  { %874 = dma.done.wait [#allocation4], 128  }
 0x2cf   :  { %875 = vsyncadd [#allocation4], 4294967168 }
 0x2d0   :  { %497 = vsyncpa [#allocation3], 1 }
 0x2d1   :  { %498 = vsyncpa [#allocation6], 1 }
 0x2d2   :  { %499 = vsyncpa [#allocation9], 1 }
 0x2d3   :  { %500 = vsyncpa [#allocation12], 1 }
 0x2d4   :  { %501 = vsyncpa [#allocation4], 1 }

</bundles_post_ra>
